<compile_context>
chip_gen: v7x
topology: tpu7x:2x2x1
jax: 0.10.0
libtpu: 0.0.40
codegen_flags: <defaults>
</compile_context>

<pallas_src>
import functools
import math

import jax
import jax.numpy as jnp
from jax.experimental import pallas as pl
from jax.experimental.pallas import tpu as pltpu

LANES = 128
SUBLANES = 8


def _awing_kernel(yp_ref, yt_ref, out_ref, *, theta, alpha, omega, epsilon,
                  numel, row_block, inner_blocks, needs_mask):
    p = pl.program_id(0)          # "parallel" axis (megacore split on v7x)
    k = pl.program_id(1)          # "arbitrary" reduction axis

    # The output block for a given p is resident across the whole k axis:
    # it doubles as the (1, 8, 128) f32 vector accumulator.
    @pl.when(k == 0)
    def _():
        out_ref[...] = jnp.zeros_like(out_ref)

    yp = yp_ref[...].astype(jnp.float32)
    yt = yt_ref[...].astype(jnp.float32)

    delta = jnp.abs(yt - yp)
    expo = alpha - yt                           # alpha - y_true

    inv_eps = 1.0 / epsilon                     # Python-float constants
    log_te = math.log(theta / epsilon)          # log of constant base

    # Non-linear branch (delta < theta): omega * log(1 + (delta/eps)^(alpha-y))
    loss1 = omega * jnp.log(1.0 + jnp.power(delta * inv_eps, expo))

    # Linear branch (delta >= theta):
    #   pow_t = (theta/eps)^(alpha-y); base is a compile-time constant, so
    #   lower it as a single exp instead of exp+log per element.
    pow_t = jnp.exp(expo * log_te)
    A = omega * pl.reciprocal(1.0 + pow_t, approx=True)
    C = theta * A - omega * jnp.log(1.0 + pow_t)
    loss2 = A * delta - C

    loss = jnp.where(delta < theta, loss1, loss2)

    if needs_mask:
        # Zero out garbage rows of a ragged last block and any duplicated
        # (wrapped) grid step.  Select kills any NaN/inf from garbage data.
        block_idx = p * inner_blocks + k
        r = jax.lax.broadcasted_iota(jnp.int32, loss.shape, 0)
        c = jax.lax.broadcasted_iota(jnp.int32, loss.shape, 1)
        gidx = block_idx * (row_block * LANES) + r * LANES + c
        loss = jnp.where(gidx < numel, loss, 0.0)

    # (row_block, 128) -> (8, 128) partial sum: pure VPU vreg adds.
    partial = loss.reshape(-1, SUBLANES, LANES).sum(axis=0)
    out_ref[...] += partial[None]


def adaptive_wing_loss(y_pred, y_true, *, theta=0.5, alpha=2.1, omega=14.0,
                       epsilon=1.0, rows_per_block=1024, num_parallel=2):
    assert y_pred.shape == y_true.shape
    numel = y_pred.size

    yp = jnp.ravel(y_pred)
    yt = jnp.ravel(y_true)

    # Pad (only when needed) so the slab is (rows, 128) with rows % 8 == 0.
    # Zero padding is loss-neutral; the mean divides by the ORIGINAL numel.
    pad_unit = SUBLANES * LANES
    n_pad = (-numel) % pad_unit
    if n_pad:
        yp = jnp.pad(yp, (0, n_pad))
        yt = jnp.pad(yt, (0, n_pad))
    rows = (numel + n_pad) // LANES
    yp = yp.reshape(rows, LANES)
    yt = yt.reshape(rows, LANES)

    # Big lane-dense blocks (default 1024 rows = 512 KiB f32 per input block),
    # clamped for small inputs, kept a multiple of 8 sublanes.
    # 2 inputs x 2 pipeline buffers x 512 KiB = 2 MiB of buffers -> fits the
    # scoped-VMEM default on all of v5e / v6e / v7x with headroom.
    row_block = max(SUBLANES, (min(rows_per_block, rows) // SUBLANES) * SUBLANES)
    total_blocks = pl.cdiv(rows, row_block)

    # Leading "parallel" axis so v7x megacore can shard across its 2 TCs.
    num_parallel = max(1, min(num_parallel, total_blocks))
    inner_blocks = pl.cdiv(total_blocks, num_parallel)
    even_split = (inner_blocks * num_parallel == total_blocks)
    needs_mask = (rows % row_block != 0) or (not even_split)

    if even_split:
        def in_map(pi, ki):
            return (pi * inner_blocks + ki, 0)
    else:
        # Wrap duplicated trailing steps onto a valid block; their
        # contribution is zeroed in-kernel by the index mask.
        def in_map(pi, ki):
            return ((pi * inner_blocks + ki) % total_blocks, 0)

    kernel = functools.partial(
        _awing_kernel,
        theta=float(theta), alpha=float(alpha), omega=float(omega),
        epsilon=float(epsilon), numel=numel, row_block=row_block,
        inner_blocks=inner_blocks, needs_mask=needs_mask)

    partials = pl.pallas_call(
        kernel,
        out_shape=jax.ShapeDtypeStruct((num_parallel, SUBLANES, LANES),
                                       jnp.float32),
        grid_spec=pltpu.PrefetchScalarGridSpec(
            num_scalar_prefetch=0,
            grid=(num_parallel, inner_blocks),
            in_specs=[
                pl.BlockSpec((row_block, LANES), in_map),
                pl.BlockSpec((row_block, LANES), in_map),
            ],
            out_specs=pl.BlockSpec((1, SUBLANES, LANES),
                                   lambda pi, ki: (pi, 0, 0)),
        ),
        compiler_params=pltpu.CompilerParams(
            dimension_semantics=("parallel", "arbitrary"),
            vmem_limit_bytes=32 * 1024 * 1024),
    )(yp, yt)

    # Single tiny cross-lane reduction + mean, outside the hot loop.
    return jnp.sum(partials) / jnp.float32(numel)


def _reference(y_pred, y_true, theta=0.5, alpha=2.1, omega=14.0, epsilon=1.0):
    yp = y_pred.astype(jnp.float32)
    yt = y_true.astype(jnp.float32)
    d = jnp.abs(yt - yp)
    expo = alpha - yt
    loss1 = omega * jnp.log(1.0 + jnp.power(d / epsilon, expo))
    pow_t = jnp.power(theta / epsilon, expo)
    A = omega / (1.0 + pow_t)
    C = theta * A - omega * jnp.log(1.0 + pow_t)
    loss2 = A * d - C
    loss = jnp.where(d < theta, loss1, loss2)
    return jnp.sum(loss) / yt.size


if __name__ == "__main__":
    key = jax.random.PRNGKey(0)

    def make_case(k, shape):
        k1, k2 = jax.random.split(k)
        y_true = jax.random.uniform(k1, shape, dtype=jnp.float32)
        y_pred = jnp.clip(
            y_true + 0.3 * jax.random.normal(k2, shape, dtype=jnp.float32),
            0.0, 1.0)
        return y_pred, y_true

    # Primary small case: batch=2, keypoint channels=4, 16x16 heatmaps.
    yp0, yt0 = make_case(key, (2, 4, 16, 16))
    loss0 = jax.block_until_ready(adaptive_wing_loss(yp0, yt0))
    ref0 = _reference(yp0, yt0)
    assert jnp.allclose(loss0, ref0, rtol=2e-3, atol=2e-4), (loss0, ref0)

    # Multi-block case: exercises the parallel axis, ragged last block and
    # the in-kernel tail mask (rows=2304, row_block=1024, 3 blocks on 2 lanes).
    yp1, yt1 = make_case(jax.random.fold_in(key, 1), (4, 8, 96, 96))
    loss1 = jax.block_until_ready(adaptive_wing_loss(yp1, yt1))
    ref1 = _reference(yp1, yt1)
    assert jnp.allclose(loss1, ref1, rtol=2e-3, atol=2e-4), (loss1, ref1)

    # Awkward element count (not a multiple of 1024): exercises the zero-pad
    # path, which is loss-neutral.
    yp2, yt2 = make_case(jax.random.fold_in(key, 2), (3, 5, 7, 11))
    loss2 = jax.block_until_ready(adaptive_wing_loss(yp2, yt2))
    ref2 = _reference(yp2, yt2)
    assert jnp.allclose(loss2, ref2, rtol=2e-3, atol=2e-4), (loss2, ref2)

    print("KERNEL_OK")
</pallas_src>

<mosaic_0001>
module attributes {stable_mosaic.version = 11 : i64} {
  func.func @_awing_kernel(%arg0: i32, %arg1: i32, %arg2: memref<16x128xf32, #tpu.memory_space<vmem>>, %arg3: memref<16x128xf32, #tpu.memory_space<vmem>>, %arg4: memref<1x8x128xf32, #tpu.memory_space<vmem>>) attributes {dimension_semantics = [#tpu.dimension_semantics<parallel>, #tpu.dimension_semantics<arbitrary>], iteration_bounds = array<i64: 1, 1>, scalar_prefetch = 0 : i64, scratch_operands = 0 : i64, tpu.core_type = #tpu.core_type<tc>, window_params = [{transform_indices = @transform_0, window_bounds = array<i64: 16, 128>}, {transform_indices = @transform_1, window_bounds = array<i64: 16, 128>}, {transform_indices = @transform_2, window_bounds = array<i64: 1, 8, 128>}]} {
    %c0_i32 = arith.constant 0 : i32
    %0 = arith.cmpi eq, %arg1, %c0_i32 : i32
    %1 = arith.extui %0 : i1 to i32
    %c0_i32_0 = arith.constant 0 : i32
    %2 = arith.cmpi ne, %1, %c0_i32_0 : i32
    scf.if %2 {
      %cst_21 = arith.constant 0.000000e+00 : f32
      %44 = vector.broadcast %cst_21 : f32 to vector<1x8x128xf32>
      %c0_22 = arith.constant 0 : index
      %c0_23 = arith.constant 0 : index
      %c0_24 = arith.constant 0 : index
      %45 = vector.load %arg4[%c0_22, %c0_23, %c0_24] : memref<1x8x128xf32, #tpu.memory_space<vmem>>, vector<1x8x128xf32>
      tpu.vector_store %arg4[%c0_22, %c0_23, %c0_24], %44 {strides = array<i32>} : memref<1x8x128xf32, #tpu.memory_space<vmem>>, vector<1x8x128xf32>,
    } else {
    }
    %c0 = arith.constant 0 : index
    %c0_1 = arith.constant 0 : index
    %3 = vector.load %arg2[%c0, %c0_1] : memref<16x128xf32, #tpu.memory_space<vmem>>, vector<16x128xf32>
    %c0_2 = arith.constant 0 : index
    %c0_3 = arith.constant 0 : index
    %4 = vector.load %arg3[%c0_2, %c0_3] : memref<16x128xf32, #tpu.memory_space<vmem>>, vector<16x128xf32>
    %5 = arith.subf %4, %3 : vector<16x128xf32>
    %6 = math.absf %5 : vector<16x128xf32>
    %cst = arith.constant 2.100000e+00 : f32
    %7 = vector.broadcast %cst : f32 to vector<16x128xf32>
    %8 = arith.subf %7, %4 : vector<16x128xf32>
    %cst_4 = arith.constant 1.000000e+00 : f32
    %9 = vector.broadcast %cst_4 : f32 to vector<16x128xf32>
    %10 = arith.mulf %6, %9 : vector<16x128xf32>
    %11 = math.powf %10, %8 : vector<16x128xf32>
    %cst_5 = arith.constant 1.000000e+00 : f32
    %12 = vector.broadcast %cst_5 : f32 to vector<16x128xf32>
    %13 = arith.addf %12, %11 : vector<16x128xf32>
    %14 = math.log %13 : vector<16x128xf32>
    %cst_6 = arith.constant 1.400000e+01 : f32
    %15 = vector.broadcast %cst_6 : f32 to vector<16x128xf32>
    %16 = arith.mulf %15, %14 : vector<16x128xf32>
    %cst_7 = arith.constant -0.693147182 : f32
    %17 = vector.broadcast %cst_7 : f32 to vector<16x128xf32>
    %18 = arith.mulf %8, %17 : vector<16x128xf32>
    %19 = math.exp %18 : vector<16x128xf32>
    %cst_8 = arith.constant 1.000000e+00 : f32
    %20 = vector.broadcast %cst_8 : f32 to vector<16x128xf32>
    %21 = arith.addf %20, %19 : vector<16x128xf32>
    %22 = tpu.reciprocal %21 {approx = true} : vector<16x128xf32> -> vector<16x128xf32>
    %cst_9 = arith.constant 1.400000e+01 : f32
    %23 = vector.broadcast %cst_9 : f32 to vector<16x128xf32>
    %24 = arith.mulf %23, %22 : vector<16x128xf32>
    %cst_10 = arith.constant 5.000000e-01 : f32
    %25 = vector.broadcast %cst_10 : f32 to vector<16x128xf32>
    %26 = arith.mulf %25, %24 : vector<16x128xf32>
    %cst_11 = arith.constant 1.000000e+00 : f32
    %27 = vector.broadcast %cst_11 : f32 to vector<16x128xf32>
    %28 = arith.addf %27, %19 : vector<16x128xf32>
    %29 = math.log %28 : vector<16x128xf32>
    %cst_12 = arith.constant 1.400000e+01 : f32
    %30 = vector.broadcast %cst_12 : f32 to vector<16x128xf32>
    %31 = arith.mulf %30, %29 : vector<16x128xf32>
    %32 = arith.subf %26, %31 : vector<16x128xf32>
    %33 = arith.mulf %24, %6 : vector<16x128xf32>
    %34 = arith.subf %33, %32 : vector<16x128xf32>
    %cst_13 = arith.constant 5.000000e-01 : f32
    %35 = vector.broadcast %cst_13 : f32 to vector<16x128xf32>
    %36 = arith.cmpf olt, %6, %35 : vector<16x128xf32>
    %37 = arith.select %36, %16, %34 : vector<16x128xi1>, vector<16x128xf32>
    %38 = vector.shape_cast %37 : vector<16x128xf32> to vector<2x8x128xf32>
    %cst_14 = arith.constant dense<0.000000e+00> : vector<8x128xf32>
    %39 = vector.multi_reduction <add>, %38, %cst_14 [0] : vector<2x8x128xf32> to vector<8x128xf32>
    %c0_15 = arith.constant 0 : index
    %c0_16 = arith.constant 0 : index
    %c0_17 = arith.constant 0 : index
    %40 = vector.load %arg4[%c0_15, %c0_16, %c0_17] : memref<1x8x128xf32, #tpu.memory_space<vmem>>, vector<1x8x128xf32>
    %41 = vector.shape_cast %39 : vector<8x128xf32> to vector<1x8x128xf32>
    %42 = arith.addf %40, %41 : vector<1x8x128xf32>
    %c0_18 = arith.constant 0 : index
    %c0_19 = arith.constant 0 : index
    %c0_20 = arith.constant 0 : index
    %43 = vector.load %arg4[%c0_18, %c0_19, %c0_20] : memref<1x8x128xf32, #tpu.memory_space<vmem>>, vector<1x8x128xf32>
    tpu.vector_store %arg4[%c0_18, %c0_19, %c0_20], %42 {strides = array<i32>} : memref<1x8x128xf32, #tpu.memory_space<vmem>>, vector<1x8x128xf32>,
    return
  }
  func.func @transform_0(%arg0: i32, %arg1: i32) -> (i32, i32) {
    %c1_i32 = arith.constant 1 : i32
    %0 = arith.muli %arg0, %c1_i32 : i32
    %1 = arith.addi %0, %arg1 : i32
    %c0_i32 = arith.constant 0 : i32
    %c0_i32_0 = arith.constant 0 : i32
    return %1, %c0_i32 : i32, i32
  }
  func.func @transform_1(%arg0: i32, %arg1: i32) -> (i32, i32) {
    %c1_i32 = arith.constant 1 : i32
    %0 = arith.muli %arg0, %c1_i32 : i32
    %1 = arith.addi %0, %arg1 : i32
    %c0_i32 = arith.constant 0 : i32
    %c0_i32_0 = arith.constant 0 : i32
    return %1, %c0_i32 : i32, i32
  }
  func.func @transform_2(%arg0: i32, %arg1: i32) -> (i32, i32, i32) {
    %c0_i32 = arith.constant 0 : i32
    %c0_i32_0 = arith.constant 0 : i32
    %c0_i32_1 = arith.constant 0 : i32
    return %arg0, %c0_i32, %c0_i32_0 : i32, i32, i32
  }
}

</mosaic_0001>

<bundles_post_ra>
// kernel: tpu_custom_call.1
= control target key start
LH: loop header
LB: loop body
LE: loop exit
PB: predicated region body
PF: predicated region fallthrough
CT: control target
= control target key end

     0   :  { %7 = vsyncpa [#allocation3], 0  ;;  %s588_s0 = inlined_call_operand.hbm [shape: f32[16,128], index: 0, kind: input, shape index: {}]   ;;  %s589_s1 = inlined_call_operand.hbm [shape: f32[16,128], index: 1, kind: input, shape index: {}]   ;;  %s590_s2 = inlined_call_operand.hbm [shape: f32[1,8,128], index: 2, kind: output, shape index: {}]  }
   0x1   :  { %8 = vsyncpa [#allocation6], 0 }
   0x2   :  { %9 = vsyncpa [#allocation4], 0  ;;  %s329_s9 = smov [#allocation2]   ;;  %s257_s13 = scalar_lea.hbm %s588_s0, 256 }
   0x3   :  { %s19_s10 = sshll.u32 %s329_s9, 4  ;;  %p258_p0 = scmp.ne.s32.totalorder %s588_s0, %s257_s13  ;;  %s20_s10 = int_to_ptr.vmem [resolvable:$true] %s19_s10 }
   0x4   :  { %p261_p1 = scmp.lt.u32.totalorder %s257_s13, %s588_s0 }
   0x6   :  { %p263_p2 = pnand %p261_p1, %p258_p0 }
   0x8   :  { %266 = shalt.err (!%p263_p2)
}
   0x9   :  { %s267_s18 = scalar_lea.vmem %s20_s10, 256  ;;  %p272_p4 = scmp.lt.s32.totalorder %s20_s10, %s20_s10 }
   0xa   :  { %p268_p3 = scmp.ne.s32.totalorder %s20_s10, %s267_s18  ;;  %p273_p5 = scmp.lt.s32.totalorder %s267_s18, %s267_s18 }
   0xc   :  { %p274_p6 = por %p273_p5, %p272_p4 }
   0xe   :  { %p275_p7 = pnand %p274_p6, %p268_p3 }
  0x10   :  { %278 = shalt.err (!%p275_p7)
}
  0x11   :  { %s330_s19 = smov 128   ;;  %s331_s20 = smov 8  }
  0x12   :  { %25 = dma.hbm_to_vmem [thread:$0]  %s588_s0, 256, %s20_s10, [#allocation3], %s330_s19, %s330_s19, %s331_s20  }
  0x13   :  { %s332_s23 = smov [#allocation5]   ;;  %s279_s27 = scalar_lea.hbm %s589_s1, 256 }
  0x14   :  { %s35_s24 = sshll.u32 %s332_s23, 4  ;;  %p280_p8 = scmp.ne.s32.totalorder %s589_s1, %s279_s27  ;;  %s36_s24 = int_to_ptr.vmem [resolvable:$true] %s35_s24 }
  0x15   :  { %p283_p9 = scmp.lt.u32.totalorder %s279_s27, %s589_s1 }
  0x17   :  { %p285_p10 = pnand %p283_p9, %p280_p8 }
  0x19   :  { %288 = shalt.err (!%p285_p10)
}
  0x1a   :  { %s289_s4 = scalar_lea.vmem %s36_s24, 256  ;;  %p294_p12 = scmp.lt.s32.totalorder %s36_s24, %s36_s24 }
  0x1b   :  { %p290_p11 = scmp.ne.s32.totalorder %s36_s24, %s289_s4  ;;  %p295_p13 = scmp.lt.s32.totalorder %s289_s4, %s289_s4 }
  0x1d   :  { %p296_p0 = por %p295_p13, %p294_p12 }
  0x1f   :  { %p297_p1 = pnand %p296_p0, %p290_p11 }
  0x21   :  { %300 = shalt.err (!%p297_p1)
}
  0x22   :  { %41 = dma.hbm_to_vmem [thread:$0]  %s589_s1, 256, %s36_s24, [#allocation6], %s330_s19, %s330_s19, %s331_s20  }
  0x23   :  { %323 = dma.done.wait [#allocation3], 256  }
  0x24   :  { %324 = vsyncadd [#allocation3], 4294967040 }
  0x25   :  { %325 = dma.done.wait [#allocation6], 256  }
  0x26   :  { %326 = vsyncadd [#allocation6], 4294967040  ;;  %v57_v0 = vld [vmem:[#allocation2] sm:$0xff]  ;;  %v58_v1 = vld [vmem:[#allocation2 + $0x8] sm:$0xff]  ;;  %v333_v33 = vmov 2139095040   ;;  %v334_v42 = vmov 0  }
  0x27   :  { %v59_v2 = vld [vmem:[#allocation5] sm:$0xff]  ;;  %v60_v3 = vld [vmem:[#allocation5 + $0x8] sm:$0xff]  ;;  %s335_s1 = smov [#allocation7]  }
  0x28   :  { %v61_v4 = vsub.f32 %v59_v2, %v57_v0  ;;  %v375_v5 = vsub.f32 2.1, %v59_v2  ;;  %v62_v6 = vsub.f32 %v60_v3, %v58_v1  ;;  %v387_v12 = vsub.f32 2.1, %v60_v3  ;;  %s117_s6 = sshll.u32 %s335_s1, 4  ;;  %s118_s6 = int_to_ptr.vmem [resolvable:$true] %s117_s6 }
  0x29   :  { %s301_s7 = scalar_lea.vmem %s118_s6, 128  ;;  %p306_p3 = scmp.lt.s32.totalorder %s118_s6, %s118_s6 }
  0x2a   :  { %v377_v7 = vand.u32 2147483647, %v61_v4  ;;  %v380_v8 = vand.u32 2147483647, %v375_v5  ;;  %v382_v9 = vand.u32 2147483647, %v62_v6  ;;  %v136_v10 = vtrunc.f32 %v375_v5  ;;  %p302_p2 = scmp.ne.s32.totalorder %s118_s6, %s301_s7  ;;  %p307_p4 = scmp.lt.s32.totalorder %s301_s7, %s301_s7 }
  0x2b   :  { %v393_v15 = vand.u32 2147483647, %v387_v12  ;;  %v185_v17 = vtrunc.f32 %v387_v12  ;;  %vm135_vm3 = vcmp.lt.f32.partialorder %v375_v5, 0  ;;  %v77_v25 = vmul.f32 -0.6931472, %v375_v5 }
  0x2c   :  { %233 = vlog2.f32 %v377_v7  ;;  %v140_v11 = vtrunc.f32 %v380_v8  ;;  %vm592_vm0 = vcmp.eq.f32.partialorder %v380_v8, 2139095040  ;;  %vm137_vm1 = vcmp.ne.f32.partialorder %v375_v5, %v136_v10  ;;  %p308_p5 = por %p307_p4, %p306_p3 }
  0x2d   :  { %235 = vlog2.f32 %v382_v9  ;;  %vm397_vm2 = vmor %vm137_vm1, %vm592_vm0  ;;  %vm595_vm4 = vcmp.eq.f32.partialorder %v377_v7, 0  ;;  %v189_v18 = vtrunc.f32 %v393_v15  ;;  %vm150_vm5 = vcmp.gt.f32.partialorder %v377_v7, 1065353216 }
  0x2e   :  { %v141_v13 = vcvt.f32.s32 %v140_v11  ;;  %vm144_vm7 = vmneg %vm397_vm2  ;;  %vm591_vm9 = vcmp.eq.f32.partialorder %v393_v15, 2139095040  ;;  %vm186_vm10 = vcmp.ne.f32.partialorder %v387_v12, %v185_v17  ;;  %vm139_vm12 = vcmp.lt.f32.partialorder %v380_v8, 1266679808  ;;  %p309_p6 = pnand %p308_p5, %p302_p2 }
  0x2f   :  { %v190_v19 = vcvt.f32.s32 %v189_v18  ;;  %vm412_vm8 = vmand %vm135_vm3, %vm595_vm4  ;;  %v78_v26 = vmul.f32 -0.6931472, %v387_v12  ;;  %v79_v30 = vmul.f32 1.442695, %v77_v25  ;;  %v164_v34 = vsel %vm135_vm3, 0, %v333_v33 }
  0x30   :  { %v142_v14 = vand.u32 1, %v141_v13  ;;  %vm420_vm11 = vmxor %vm135_vm3, %vm150_vm5  ;;  %v165_v37 = vxor.u32 2147483648, %v164_v34  ;;  %vm149_vm4 = vcmp.eq.f32.partialorder %v377_v7, 1065353216  ;;  %v154_v47 = vsel %vm135_vm3, 2139095040, %v334_v42 }
  0x31   :  { %v191_v23 = vand.u32 1, %v190_v19  ;;  %vm430_vm14 = vmor %vm186_vm10, %vm591_vm9  ;;  %v81_v31 = vmul.f32 1.442695, %v78_v26  ;;  %vm182_vm3 = vcmp.eq.f32.partialorder %v387_v12, 0 }
  0x32   :  { %vm143_vm6 = vcmp.eq.s32.totalorder %v142_v14, 1  ;;  %vm193_vm1 = vmneg %vm430_vm14 }
  0x33   :  { %vm145_vm13 = vmand %vm143_vm6, %vm144_vm7  ;;  %vm434_vm15 = vcmp.eq.s32.totalorder %v191_v23, 1  ;;  %vm594_vm6 = vcmp.lt.f32.partialorder %v387_v12, 0  ;;  %vm593_vm7 = vcmp.eq.f32.partialorder %v382_v9, 0 }
  0x34   :  { %vm440_vm5 = vmand %vm139_vm12, %vm145_vm13  ;;  %vm199_vm12 = vcmp.gt.f32.partialorder %v382_v9, 1065353216  ;;  %vm147_vm13 = vcmp.lt.f32.partialorder %v377_v7, 0  ;;  %v213_v39 = vsel %vm594_vm6, 0, %v333_v33 }
  0x35   :  { %vm159_vm10 = vmor %vm412_vm8, %vm420_vm11  ;;  %vm188_vm8 = vcmp.lt.f32.partialorder %v393_v15, 1266679808  ;;  %v214_v44 = vxor.u32 2147483648, %v213_v39  ;;  %v166_v45 = vsel %vm440_vm5, %v165_v37, %v164_v34  ;;  %vm151_vm5 = vcmp.eq.f32.partialorder %v377_v7, 2139095040 }
  0x36   :  { %v234_v21 = vpop.eup %233  ;;  %vm457_vm9 = vmand %vm434_vm15, %vm193_vm1  ;;  %v160_v43 = vsel %vm159_vm10, 2139095040, %v334_v42  ;;  %vm161_vm1 = vcmp.eq.f32.partialorder %v377_v7, 3212836864  ;;  %vm196_vm10 = vcmp.lt.f32.partialorder %v382_v9, 0  ;;  %v167_v52 = vsel %vm147_vm13, %v166_v45, %v164_v34 }
  0x37   :  { %v129_v24 = vmul.f32 %v234_v21, %v375_v5  ;;  %v236_v28 = vpop.eup %235  ;;  %vm465_vm0 = vmand %vm594_vm6, %vm593_vm7  ;;  %vm133_vm7 = vcmp.eq.f32.partialorder %v375_v5, 0  ;;  %v162_v49 = vsel %vm161_vm1, 1065353216, %v160_v43  ;;  %vm620_vm1 = vcmp.eq.f32.partialorder %v377_v7, 0 }
  0x38   :  { %v178_v35 = vmul.f32 %v236_v28, %v387_v12  ;;  %vm474_vm11 = vmxor %vm594_vm6, %vm199_vm12  ;;  %vm134_vm6 = vcmp.eq.f32.partialorder %v375_v5, 1065353216 }
  0x39   :  { %237 = vpow2.f32 %v129_v24  ;;  %vm482_vm15 = vmand %vm147_vm13, %vm397_vm2  ;;  %vm623_vm13 = vcmp.lt.f32.partialorder %v387_v12, 0 }
  0x3a   :  { %239 = vpow2.f32 %v79_v30  ;;  %vm208_vm12 = vmor %vm465_vm0, %vm474_vm11  ;;  %vm169_vm0 = vcmp.ne.f32.partialorder %v377_v7, %v377_v7  ;;  %vm170_vm11 = vcmp.ne.f32.partialorder %v375_v5, %v375_v5  ;;  %v203_v58 = vsel %vm623_vm13, 2139095040, %v334_v42 }
  0x3b   :  { %241 = vpow2.f32 %v178_v35  ;;  %vm497_vm2 = vmand %vm188_vm8, %vm457_vm9  ;;  %v209_v50 = vsel %vm208_vm12, 2139095040, %v334_v42  ;;  %vm210_vm9 = vcmp.eq.f32.partialorder %v382_v9, 3212836864  ;;  %vm219_vm12 = vcmp.ne.f32.partialorder %v387_v12, %v387_v12 }
  0x3c   :  { %243 = vpow2.f32 %v81_v31  ;;  %vm520_vm8 = vmand %vm196_vm10, %vm430_vm14  ;;  %v215_v54 = vsel %vm497_vm2, %v214_v44, %v213_v39  ;;  %vm218_vm14 = vcmp.ne.f32.partialorder %v382_v9, %v382_v9  ;;  %vm624_vm2 = vcmp.eq.f32.partialorder %v380_v8, 2139095040 }
  0x3d   :  { %v211_v61 = vsel %vm210_vm9, 1065353216, %v209_v50  ;;  %v216_v2 = vsel %vm196_vm10, %v215_v54, %v213_v39  ;;  %vm183_vm9 = vcmp.eq.f32.partialorder %v387_v12, 1065353216 }
  0x43   :  { %v238_v48 = vpop.eup %237 }
  0x44   :  { %v153_v51 = vsel %vm482_vm15, 2143289344, %v238_v48  ;;  %v240_v55 = vpop.eup %239  ;;  %vm528_vm15 = vmor %vm169_vm0, %vm170_vm11  ;;  %vm198_vm11 = vcmp.eq.f32.partialorder %v382_v9, 1065353216 }
  0x45   :  { %v155_v56 = vsel %vm620_vm1, %v154_v47, %v153_v51  ;;  %v242_v59 = vpop.eup %241  ;;  %vm173_vm0 = vmor %vm149_vm4, %vm133_vm7  ;;  %v83_v62 = vadd.f32 1.0, %v240_v55  ;;  %vm200_vm1 = vcmp.eq.f32.partialorder %v382_v9, 2139095040  ;;  %vm625_vm4 = vcmp.eq.f32.partialorder %v382_v9, 0 }
  0x46   :  { %v163_v60 = vsel %vm624_vm2, %v162_v49, %v155_v56  ;;  %v244_v63 = vpop.eup %243  ;;  %v202_v1 = vsel %vm520_vm8, 2143289344, %v242_v59  ;;  %vm220_vm7 = vmor %vm218_vm14, %vm219_vm12 }
  0x47   :  { %v168_v0 = vsel %vm151_vm5, %v167_v52, %v163_v60  ;;  %v204_v4 = vsel %vm625_vm4, %v203_v58, %v202_v1  ;;  %v84_v6 = vadd.f32 1.0, %v244_v63  ;;  %245 = vrcp.f32 %v83_v62  ;;  %vm222_vm10 = vmor %vm198_vm11, %vm182_vm3 }
  0x48   :  { %v172_v3 = vsel %vm528_vm15, 2143289344, %v168_v0  ;;  %vm626_vm5 = vcmp.eq.f32.partialorder %v393_v15, 2139095040  ;;  %247 = vlog2.f32 %v83_v62  ;;  %vm104_vm3 = vcmp.lt.f32.partialorder %v382_v9, 0.5 }
  0x49   :  { %v174_v8 = vsel %vm173_vm0, 1065353216, %v172_v3  ;;  %v212_v10 = vsel %vm626_vm5, %v211_v61, %v204_v4  ;;  %249 = vrcp.f32 %v84_v6 }
  0x4a   :  { %v175_v11 = vsel %vm134_vm6, %v377_v7, %v174_v8  ;;  %v217_v13 = vsel %vm200_vm1, %v216_v2, %v212_v10  ;;  %251 = vlog2.f32 %v84_v6  ;;  %vm103_vm6 = vcmp.lt.f32.partialorder %v377_v7, 0.5 }
  0x4b   :  { %v221_v14 = vsel %vm220_vm7, 2143289344, %v217_v13  ;;  %v69_v16 = vadd.f32 1.0, %v175_v11 }
  0x4c   :  { %v223_v17 = vsel %vm222_vm10, 1065353216, %v221_v14 }
  0x4d   :  { %v224_v15 = vsel %vm183_vm9, %v382_v9, %v223_v17  ;;  %253 = vlog2.f32 %v69_v16 }
  0x4e   :  { %v70_v18 = vadd.f32 1.0, %v224_v15 }
  0x50   :  { %255 = vlog2.f32 %v70_v18 }
  0x51   :  { %v246_v19 = vpop.eup %245 }
  0x52   :  { %v248_v20 = vpop.eup %247  ;;  %v87_v21 = vmul.f32 14.0, %v246_v19 }
  0x53   :  { %v250_v22 = vpop.eup %249  ;;  %v92_v23 = vmul.f32 0.6931472, %v248_v20 }
  0x54   :  { %v252_v5 = vpop.eup %251  ;;  %v88_v24 = vmul.f32 14.0, %v250_v22  ;;  %v89_v25 = vmul.f32 0.5, %v87_v21  ;;  %v99_v27 = vmul.f32 %v87_v21, %v377_v7 }
  0x55   :  { %v94_v12 = vmul.f32 0.6931472, %v252_v5  ;;  %v95_v26 = vmul.f32 14.0, %v92_v23 }
  0x56   :  { %v90_v29 = vmul.f32 0.5, %v88_v24  ;;  %v100_v33 = vmul.f32 %v88_v24, %v382_v9 }
  0x57   :  { %v254_v28 = vpop.eup %253  ;;  %v96_v31 = vmul.f32 14.0, %v94_v12  ;;  %v97_v32 = vsub.f32 %v89_v25, %v95_v26 }
  0x58   :  { %v72_v30 = vmul.f32 0.6931472, %v254_v28 }
  0x59   :  { %v98_v36 = vsub.f32 %v90_v29, %v96_v31  ;;  %v101_v37 = vsub.f32 %v99_v27, %v97_v32 }
  0x5a   :  { %v256_v34 = vpop.eup %255  ;;  %v75_v35 = vmul.f32 14.0, %v72_v30 }
  0x5b   :  { %v74_v38 = vmul.f32 0.6931472, %v256_v34  ;;  %v102_v39 = vsub.f32 %v100_v33, %v98_v36 }
  0x5c   :  { %v105_v41 = vsel %vm103_vm6, %v75_v35, %v101_v37 }
  0x5d   :  { %v76_v40 = vmul.f32 14.0, %v74_v38 }
  0x5f   :  { %v106_v42 = vsel %vm104_vm3, %v76_v40, %v102_v39 }
  0x60   :  { %v107_v43 = vadd.f32 %v106_v42, %v105_v41 }
  0x62   :  { %110 = vst [vmem:[#allocation7] sm:$0xff] %v107_v43 }
  0x63   :  { %312 = shalt.err (!%p309_p6)
}
  0x64   :  { %s313_s10 = scalar_lea.hbm %s590_s2, 128 }
  0x65   :  { %p314_p7 = scmp.ne.s32.totalorder %s590_s2, %s313_s10  ;;  %p317_p8 = scmp.lt.u32.totalorder %s313_s10, %s590_s2 }
  0x67   :  { %p319_p9 = pnand %p317_p8, %p314_p7 }
  0x69   :  { %322 = shalt.err (!%p319_p9)
}
  0x6a   :  { %120 = dma.vmem_to_hbm [thread:$0]  %s118_s6, 128, %s590_s2, [#allocation4]  }
  0x6b   :  { %327 = dma.done.wait [#allocation4], 128  }
  0x6c   :  { %328 = vsyncadd [#allocation4], 4294967168 }
  0x6d   :  { %124 = vsyncpa [#allocation3], 1 }
  0x6e   :  { %125 = vsyncpa [#allocation6], 1 }
  0x6f   :  { %126 = vsyncpa [#allocation4], 1 }

</bundles_post_ra>
